<compile_context>
chip_gen: v5e
topology: v5e:2x2
jax: 0.10.0
libtpu: 0.0.40
codegen_flags: <defaults>
</compile_context>

<pallas_src>
import jax
import jax.numpy as jnp
from jax import lax
from jax.experimental import pallas as pl
from jax.experimental.pallas import tpu as pltpu

D_IN, D_H1, D_H2, D_OUT = 512, 256, 128, 2
D_OUT_PAD = 128  # lane-dense padded output width


def _gelu_exact(x):
    # PyTorch F.gelu default (approximate='none'): 0.5*x*(1+erf(x/sqrt(2))), done in f32.
    return 0.5 * x * (1.0 + lax.erf(x * jnp.float32(0.7071067811865476)))


def mlp_kernel(x_ref, w1_ref, b1_ref, w2_ref, b2_ref, w3_ref, b3_ref, o_ref):
    # bf16 operands on the MXU, f32 accumulation; elementwise math in f32.
    x = x_ref[...]                                                      # (tm, 512) bf16
    h1 = jnp.dot(x, w1_ref[...], preferred_element_type=jnp.float32)    # (tm, 256) f32
    h1 = _gelu_exact(h1 + b1_ref[...])
    h2 = jnp.dot(h1.astype(jnp.bfloat16), w2_ref[...],
                 preferred_element_type=jnp.float32)                    # (tm, 128) f32
    h2 = _gelu_exact(h2 + b2_ref[...])
    # TODO(synk): dropout (self.d2) is treated as inference-mode identity (no mask/scale).
    out = jnp.dot(h2.astype(jnp.bfloat16), w3_ref[...],
                  preferred_element_type=jnp.float32)                   # (tm, 128) f32
    o_ref[...] = (out + b3_ref[...]).astype(o_ref.dtype)


def nn_forward(x, params, *, tm=None):
    B = x.shape[0]
    if tm is None:
        # Small batches: one grid step (block == full padded array, no pipeline overhead).
        # Large batches: 256-row tiles (multiple of 128 -> full MXU rows on all gens).
        tm = B if B <= 256 else 256

    w1, b1, w2, b2, w3, b3 = params

    # bf16 MXU operands (weights + activations); biases stay f32.
    xb = x.astype(jnp.bfloat16)
    w1b = w1.astype(jnp.bfloat16)
    w2b = w2.astype(jnp.bfloat16)
    # Zero-pad the 2-wide projection to 128 lanes for a lane-dense output store.
    w3p = jnp.zeros((D_H2, D_OUT_PAD), jnp.bfloat16).at[:, :D_OUT].set(
        w3.astype(jnp.bfloat16))
    b3p = jnp.zeros((1, D_OUT_PAD), jnp.float32).at[:, :D_OUT].set(b3)

    # Pad batch to a multiple of tm (zero rows are sliced off afterwards).
    grid_m = pl.cdiv(B, tm)
    B_pad = grid_m * tm
    if B_pad != B:
        xb = jnp.pad(xb, ((0, B_pad - B), (0, 0)))

    out = pl.pallas_call(
        mlp_kernel,
        out_shape=jax.ShapeDtypeStruct((B_pad, D_OUT_PAD), jnp.float32),
        grid_spec=pltpu.PrefetchScalarGridSpec(
            num_scalar_prefetch=0,
            grid=(grid_m,),
            in_specs=[
                pl.BlockSpec((tm, D_IN), lambda i: (i, 0)),
                # Weight/bias blocks: constant index_map -> resident (revisited) in VMEM.
                pl.BlockSpec((D_IN, D_H1), lambda i: (0, 0)),
                pl.BlockSpec((1, D_H1), lambda i: (0, 0)),
                pl.BlockSpec((D_H1, D_H2), lambda i: (0, 0)),
                pl.BlockSpec((1, D_H2), lambda i: (0, 0)),
                pl.BlockSpec((D_H2, D_OUT_PAD), lambda i: (0, 0)),
                pl.BlockSpec((1, D_OUT_PAD), lambda i: (0, 0)),
            ],
            out_specs=pl.BlockSpec((tm, D_OUT_PAD), lambda i: (i, 0)),
        ),
        compiler_params=pltpu.CompilerParams(
            dimension_semantics=("parallel",)
        ),
    )(xb, w1b, b1, w2b, b2, w3p, b3p)

    return out[:B, :D_OUT]


def init_params(key):
    # kaiming_normal_ with nonlinearity='relu': std = sqrt(2 / fan_in); biases use the
    # PyTorch Linear default U(-1/sqrt(fan_in), 1/sqrt(fan_in)).
    k1, k2, k3, kb1, kb2, kb3 = jax.random.split(key, 6)

    def kaiming(k, fan_in, fan_out):
        std = jnp.sqrt(2.0 / fan_in)
        # stored as (in, out) = transpose of PyTorch (out, in)
        return jax.random.normal(k, (fan_in, fan_out), jnp.float32) * std

    def bias(k, fan_in, fan_out):
        bound = 1.0 / jnp.sqrt(fan_in)
        return jax.random.uniform(k, (1, fan_out), jnp.float32, -bound, bound)

    w1 = kaiming(k1, D_IN, D_H1)
    b1 = bias(kb1, D_IN, D_H1)
    w2 = kaiming(k2, D_H1, D_H2)
    b2 = bias(kb2, D_H1, D_H2)
    w3 = kaiming(k3, D_H2, D_OUT)
    b3 = bias(kb3, D_H2, D_OUT)
    return (w1, b1, w2, b2, w3, b3)


if __name__ == "__main__":
    key = jax.random.PRNGKey(0)
    kx, kp = jax.random.split(key)
    B = 16
    x = jax.random.normal(kx, (B, D_IN), jnp.float32)
    params = init_params(kp)

    out = nn_forward(x, params)
    jax.block_until_ready(out)
    assert out.shape == (B, D_OUT)

    # Reference in plain JAX with the same bf16-operand / f32-accumulate recipe.
    w1, b1, w2, b2, w3, b3 = params
    xb = x.astype(jnp.bfloat16)
    h = _gelu_exact(
        jnp.dot(xb, w1.astype(jnp.bfloat16), preferred_element_type=jnp.float32) + b1)
    h = _gelu_exact(
        jnp.dot(h.astype(jnp.bfloat16), w2.astype(jnp.bfloat16),
                preferred_element_type=jnp.float32) + b2)
    ref = jnp.dot(h.astype(jnp.bfloat16), w3.astype(jnp.bfloat16),
                  preferred_element_type=jnp.float32) + b3
    assert jnp.allclose(out, ref, atol=5e-3, rtol=5e-3), (
        float(jnp.max(jnp.abs(out - ref))))
    print("KERNEL_OK")
</pallas_src>

<mosaic_0001>
module attributes {stable_mosaic.version = 11 : i64} {
  func.func @mlp_kernel(%arg0: i32, %arg1: memref<16x512xbf16, #tpu.memory_space<vmem>>, %arg2: memref<512x256xbf16, #tpu.memory_space<vmem>>, %arg3: memref<1x256xf32, #tpu.memory_space<vmem>>, %arg4: memref<256x128xbf16, #tpu.memory_space<vmem>>, %arg5: memref<1x128xf32, #tpu.memory_space<vmem>>, %arg6: memref<128x128xbf16, #tpu.memory_space<vmem>>, %arg7: memref<1x128xf32, #tpu.memory_space<vmem>>, %arg8: memref<16x128xf32, #tpu.memory_space<vmem>>) attributes {dimension_semantics = [#tpu.dimension_semantics<parallel>], iteration_bounds = array<i64: 1>, scalar_prefetch = 0 : i64, scratch_operands = 0 : i64, tpu.core_type = #tpu.core_type<tc>, window_params = [{transform_indices = @transform_0, window_bounds = array<i64: 16, 512>}, {pipeline_mode = #tpu.pipeline_mode<synchronous>, transform_indices = @transform_1, window_bounds = array<i64: 512, 256>}, {pipeline_mode = #tpu.pipeline_mode<synchronous>, transform_indices = @transform_2, window_bounds = array<i64: 1, 256>}, {pipeline_mode = #tpu.pipeline_mode<synchronous>, transform_indices = @transform_3, window_bounds = array<i64: 256, 128>}, {pipeline_mode = #tpu.pipeline_mode<synchronous>, transform_indices = @transform_4, window_bounds = array<i64: 1, 128>}, {pipeline_mode = #tpu.pipeline_mode<synchronous>, transform_indices = @transform_5, window_bounds = array<i64: 128, 128>}, {pipeline_mode = #tpu.pipeline_mode<synchronous>, transform_indices = @transform_6, window_bounds = array<i64: 1, 128>}, {transform_indices = @transform_7, window_bounds = array<i64: 16, 128>}]} {
    %c0 = arith.constant 0 : index
    %c0_0 = arith.constant 0 : index
    %0 = vector.load %arg1[%c0, %c0_0] : memref<16x512xbf16, #tpu.memory_space<vmem>>, vector<16x512xbf16>
    %c0_1 = arith.constant 0 : index
    %c0_2 = arith.constant 0 : index
    %1 = vector.load %arg2[%c0_1, %c0_2] : memref<512x256xbf16, #tpu.memory_space<vmem>>, vector<512x256xbf16>
    %cst = arith.constant dense<0.000000e+00> : vector<16x256xf32>
    %2 = tpu.matmul %0, %1, %cst {dimension_numbers = #tpu.dot_dimension_numbers<[1], [0], [0], [1], [0, 0, 1, 1], [], []>} : vector<16x512xbf16>, vector<512x256xbf16>, vector<16x256xf32> -> vector<16x256xf32>
    %c0_3 = arith.constant 0 : index
    %c0_4 = arith.constant 0 : index
    %3 = vector.load %arg3[%c0_3, %c0_4] : memref<1x256xf32, #tpu.memory_space<vmem>>, vector<1x256xf32>
    %4 = vector.broadcast %3 : vector<1x256xf32> to vector<16x256xf32>
    %5 = arith.addf %2, %4 : vector<16x256xf32>
    %cst_5 = arith.constant 5.000000e-01 : f32
    %6 = vector.broadcast %cst_5 : f32 to vector<16x256xf32>
    %7 = arith.mulf %6, %5 : vector<16x256xf32>
    %cst_6 = arith.constant 0.707106769 : f32
    %8 = vector.broadcast %cst_6 : f32 to vector<16x256xf32>
    %9 = arith.mulf %5, %8 : vector<16x256xf32>
    %10 = math.erf %9 : vector<16x256xf32>
    %cst_7 = arith.constant 1.000000e+00 : f32
    %11 = vector.broadcast %cst_7 : f32 to vector<16x256xf32>
    %12 = arith.addf %11, %10 : vector<16x256xf32>
    %13 = arith.mulf %7, %12 : vector<16x256xf32>
    %14 = arith.truncf %13 : vector<16x256xf32> to vector<16x256xbf16>
    %c0_8 = arith.constant 0 : index
    %c0_9 = arith.constant 0 : index
    %15 = vector.load %arg4[%c0_8, %c0_9] : memref<256x128xbf16, #tpu.memory_space<vmem>>, vector<256x128xbf16>
    %cst_10 = arith.constant dense<0.000000e+00> : vector<16x128xf32>
    %16 = tpu.matmul %14, %15, %cst_10 {dimension_numbers = #tpu.dot_dimension_numbers<[1], [0], [0], [1], [0, 0, 1, 1], [], []>} : vector<16x256xbf16>, vector<256x128xbf16>, vector<16x128xf32> -> vector<16x128xf32>
    %c0_11 = arith.constant 0 : index
    %c0_12 = arith.constant 0 : index
    %17 = vector.load %arg5[%c0_11, %c0_12] : memref<1x128xf32, #tpu.memory_space<vmem>>, vector<1x128xf32>
    %18 = vector.broadcast %17 : vector<1x128xf32> to vector<16x128xf32>
    %19 = arith.addf %16, %18 : vector<16x128xf32>
    %cst_13 = arith.constant 5.000000e-01 : f32
    %20 = vector.broadcast %cst_13 : f32 to vector<16x128xf32>
    %21 = arith.mulf %20, %19 : vector<16x128xf32>
    %cst_14 = arith.constant 0.707106769 : f32
    %22 = vector.broadcast %cst_14 : f32 to vector<16x128xf32>
    %23 = arith.mulf %19, %22 : vector<16x128xf32>
    %24 = math.erf %23 : vector<16x128xf32>
    %cst_15 = arith.constant 1.000000e+00 : f32
    %25 = vector.broadcast %cst_15 : f32 to vector<16x128xf32>
    %26 = arith.addf %25, %24 : vector<16x128xf32>
    %27 = arith.mulf %21, %26 : vector<16x128xf32>
    %28 = arith.truncf %27 : vector<16x128xf32> to vector<16x128xbf16>
    %c0_16 = arith.constant 0 : index
    %c0_17 = arith.constant 0 : index
    %29 = vector.load %arg6[%c0_16, %c0_17] : memref<128x128xbf16, #tpu.memory_space<vmem>>, vector<128x128xbf16>
    %cst_18 = arith.constant dense<0.000000e+00> : vector<16x128xf32>
    %30 = tpu.matmul %28, %29, %cst_18 {dimension_numbers = #tpu.dot_dimension_numbers<[1], [0], [0], [1], [0, 0, 1, 1], [], []>} : vector<16x128xbf16>, vector<128x128xbf16>, vector<16x128xf32> -> vector<16x128xf32>
    %c0_19 = arith.constant 0 : index
    %c0_20 = arith.constant 0 : index
    %31 = vector.load %arg7[%c0_19, %c0_20] : memref<1x128xf32, #tpu.memory_space<vmem>>, vector<1x128xf32>
    %32 = vector.broadcast %31 : vector<1x128xf32> to vector<16x128xf32>
    %33 = arith.addf %30, %32 : vector<16x128xf32>
    %c0_21 = arith.constant 0 : index
    %c0_22 = arith.constant 0 : index
    %34 = vector.load %arg8[%c0_21, %c0_22] : memref<16x128xf32, #tpu.memory_space<vmem>>, vector<16x128xf32>
    tpu.vector_store %arg8[%c0_21, %c0_22], %33 {strides = array<i32>} : memref<16x128xf32, #tpu.memory_space<vmem>>, vector<16x128xf32>,
    return
  }
  func.func @transform_0(%arg0: i32) -> (i32, i32) {
    %c0_i32 = arith.constant 0 : i32
    %c0_i32_0 = arith.constant 0 : i32
    return %arg0, %c0_i32 : i32, i32
  }
  func.func @transform_1(%arg0: i32) -> (i32, i32) {
    %c0_i32 = arith.constant 0 : i32
    %c0_i32_0 = arith.constant 0 : i32
    %c0_i32_1 = arith.constant 0 : i32
    return %c0_i32, %c0_i32_0 : i32, i32
  }
  func.func @transform_2(%arg0: i32) -> (i32, i32) {
    %c0_i32 = arith.constant 0 : i32
    %c0_i32_0 = arith.constant 0 : i32
    %c0_i32_1 = arith.constant 0 : i32
    return %c0_i32, %c0_i32_0 : i32, i32
  }
  func.func @transform_3(%arg0: i32) -> (i32, i32) {
    %c0_i32 = arith.constant 0 : i32
    %c0_i32_0 = arith.constant 0 : i32
    %c0_i32_1 = arith.constant 0 : i32
    return %c0_i32, %c0_i32_0 : i32, i32
  }
  func.func @transform_4(%arg0: i32) -> (i32, i32) {
    %c0_i32 = arith.constant 0 : i32
    %c0_i32_0 = arith.constant 0 : i32
    %c0_i32_1 = arith.constant 0 : i32
    return %c0_i32, %c0_i32_0 : i32, i32
  }
  func.func @transform_5(%arg0: i32) -> (i32, i32) {
    %c0_i32 = arith.constant 0 : i32
    %c0_i32_0 = arith.constant 0 : i32
    %c0_i32_1 = arith.constant 0 : i32
    return %c0_i32, %c0_i32_0 : i32, i32
  }
  func.func @transform_6(%arg0: i32) -> (i32, i32) {
    %c0_i32 = arith.constant 0 : i32
    %c0_i32_0 = arith.constant 0 : i32
    %c0_i32_1 = arith.constant 0 : i32
    return %c0_i32, %c0_i32_0 : i32, i32
  }
  func.func @transform_7(%arg0: i32) -> (i32, i32) {
    %c0_i32 = arith.constant 0 : i32
    %c0_i32_0 = arith.constant 0 : i32
    return %arg0, %c0_i32 : i32, i32
  }
}

</mosaic_0001>

<bundles_post_ra>
// kernel: tpu_custom_call.1
= control target key start
LH: loop header
LB: loop body
LE: loop exit
PB: predicated region body
PF: predicated region fallthrough
CT: control target
= control target key end

     0   :  { %12 = vsyncpa [#allocation3], 0  ;;  %s2016_s0 = inlined_call_operand.hbm [shape: bf16[16,512], index: 0, kind: input, shape index: {}]   ;;  %s2017_s1 = inlined_call_operand.hbm [shape: bf16[512,256], index: 1, kind: input, shape index: {}]   ;;  %s2018_s2 = inlined_call_operand.hbm [shape: f32[1,256], index: 2, kind: input, shape index: {}]   ;;  %s2019_s3 = inlined_call_operand.hbm [shape: bf16[256,128], index: 3, kind: input, shape index: {}]   ;;  %s2020_s4 = inlined_call_operand.vmem [shape: f32[1,128], index: 4, kind: input, shape index: {}]   ;;  %s2021_s5 = inlined_call_operand.hbm [shape: bf16[128,128], index: 5, kind: input, shape index: {}]   ;;  %s2022_s6 = inlined_call_operand.vmem [shape: f32[1,128], index: 6, kind: input, shape index: {}]   ;;  %s2023_s7 = inlined_call_operand.hbm [shape: f32[16,128], index: 7, kind: output, shape index: {}]  }
   0x1   :  { %13 = vsyncpa [#allocation6], 0 }
   0x2   :  { %14 = vsyncpa [#allocation9], 0  ;;  %s33_s26 = sshll.u32 %s2017_s1, 4  ;;  %s34_s26 = int_to_ptr.hbm [resolvable:$true] %s33_s26 }
   0x3   :  { %15 = vsyncpa [#allocation4], 0  ;;  %s1805_s27 = smov [#allocation5]   ;;  %s57_s8 = sshll.u32 %s2019_s3, 4  ;;  %s58_s8 = int_to_ptr.hbm [resolvable:$true] %s57_s8 }
   0x4   :  { %s35_s28 = sshll.u32 %s1805_s27, 4  ;;  %s1806_s9 = smov 128   ;;  %s36_s28 = int_to_ptr.vmem [resolvable:$true] %s35_s28 }
   0x5   :  { %s1807_s10 = smov 8   ;;  %s1808_s11 = smov [#allocation8]  }
   0x6   :  { %41 = dma.hbm_to_vmem [thread:$0]  %s34_s26, 8192, %s36_s28, [#allocation6], %s1806_s9, %s1806_s9, %s1807_s10  }
   0x7   :  { %s59_s12 = sshll.u32 %s1808_s11, 4  ;;  %s1809_s1 = smov 64   ;;  %s60_s12 = int_to_ptr.vmem [resolvable:$true] %s59_s12 }
   0x8   :  { %s1810_s13 = smov 4   ;;  %s20_s16 = sshll.u32 %s2016_s0, 4  ;;  %s21_s16 = int_to_ptr.hbm [resolvable:$true] %s20_s16 }
   0x9   :  { %65 = dma.hbm_to_vmem [thread:$0]  %s58_s8, 2048, %s60_s12, [#allocation9], %s1809_s1, %s1809_s1, %s1810_s13  }
   0xa   :  { %s1811_s17 = smov [#allocation2]   ;;  %s47_s20 = sshll.u32 %s2018_s2, 4  ;;  %s48_s20 = int_to_ptr.hbm [resolvable:$true] %s47_s20 }
   0xb   :  { %s22_s3 = sshll.u32 %s1811_s17, 4  ;;  %s1812_s21 = smov 256   ;;  %s23_s3 = int_to_ptr.vmem [resolvable:$true] %s22_s3 }
   0xc   :  { %s1813_s22 = smov 16   ;;  %s1814_s23 = smov [#allocation7]  }
   0xd   :  { %28 = dma.hbm_to_vmem [thread:$0]  %s21_s16, 512, %s23_s3, [#allocation3], %s1812_s21, %s1812_s21, %s1813_s22  }
   0xe   :  { %s49_s24 = sshll.u32 %s1814_s23, 4  ;;  %s72_s27 = sshll.u32 %s2021_s5, 4  ;;  %s50_s24 = int_to_ptr.vmem [resolvable:$true] %s49_s24  ;;  %s73_s27 = int_to_ptr.hbm [resolvable:$true] %s72_s27 }
   0xf   :  { %52 = dma.hbm_to_vmem [thread:$0]  %s48_s20, 32, %s50_s24, [#allocation6]  }
  0x10   :  { %s1815_s0 = smov [#allocation10]  }
  0x11   :  { %s74_s28 = sshll.u32 %s1815_s0, 4  ;;  %s75_s28 = int_to_ptr.vmem [resolvable:$true] %s74_s28 }
  0x12   :  { %80 = dma.hbm_to_vmem [thread:$0]  %s73_s27, 1024, %s75_s28, [#allocation9], %s1809_s1, %s1809_s1, %s1810_s13  }
  0x13   :  { %1797 = dma.done.wait [#allocation3], 512  }
  0x14   :  { %1798 = vsyncadd [#allocation3], 4294966784 }
  0x15   :  { %1799 = dma.done.wait [#allocation6], 8224  }
  0x16   :  { %1800 = vsyncadd [#allocation6], 4294959072 }
  0x17   :  { %1801 = dma.done.wait [#allocation9], 3072  }
  0x18   :  { %1802 = vsyncadd [#allocation9], 4294964224  ;;  %v1235_v0 = vld [vmem:[#allocation5 + $0x70] sm:$0xf]  ;;  %v1554_v1 = vld [vmem:[#allocation5 + $0x74] sm:$0xf0] }
  0x19   :  { %v1299_v2 = vld [vmem:[#allocation5 + $0xf0] sm:$0xf]  ;;  %v1236_v3 = vor.u32 %v1554_v1, %v1235_v0  ;;  %v1570_v4 = vld [vmem:[#allocation5 + $0xf4] sm:$0xf0]  ;;  %v1227_v11 = vld [vmem:[#allocation5 + $0x60] sm:$0xf] }
  0x1a   :  { %v1363_v5 = vld [vmem:[#allocation5 + $0x170] sm:$0xf]  ;;  %v1586_v6 = vld [vmem:[#allocation5 + $0x174] sm:$0xf0]  ;;  %v1300_v7 = vor.u32 %v1570_v4, %v1299_v2  ;;  %v1552_v13 = vld [vmem:[#allocation5 + $0x64] sm:$0xf0] }
  0x1b   :  { %v1364_v8 = vor.u32 %v1586_v6, %v1363_v5  ;;  %v1427_v9 = vld [vmem:[#allocation5 + $0x1f0] sm:$0xf]  ;;  %v1602_v10 = vld [vmem:[#allocation5 + $0x1f4] sm:$0xf0]  ;;  %517 = vmatpush.bf16.msra.mxu0 %v1236_v3  ;;  %v1291_v14 = vld [vmem:[#allocation5 + $0xe0] sm:$0xf]  ;;  %v1228_v16 = vor.u32 %v1552_v13, %v1227_v11 }
  0x1c   :  { %v1428_v12 = vor.u32 %v1602_v10, %v1427_v9  ;;  %v1568_v15 = vld [vmem:[#allocation5 + $0xe4] sm:$0xf0]  ;;  %531 = vmatpush.bf16.msra.mxu1 %v1300_v7  ;;  %v1355_v18 = vld [vmem:[#allocation5 + $0x160] sm:$0xf]  ;;  %v1219_v23 = vld [vmem:[#allocation5 + $0x50] sm:$0xf] }
  0x1d   :  { %545 = vmatpush.bf16.msra.mxu2 %v1364_v8  ;;  %v1292_v17 = vor.u32 %v1568_v15, %v1291_v14  ;;  %v1584_v19 = vld [vmem:[#allocation5 + $0x164] sm:$0xf0]  ;;  %v1419_v20 = vld [vmem:[#allocation5 + $0x1e0] sm:$0xf]  ;;  %v1550_v24 = vld [vmem:[#allocation5 + $0x54] sm:$0xf0] }
  0x1e   :  { %559 = vmatpush.bf16.msra.mxu3 %v1428_v12  ;;  %v1356_v21 = vor.u32 %v1584_v19, %v1355_v18  ;;  %v1600_v22 = vld [vmem:[#allocation5 + $0x1e4] sm:$0xf0]  ;;  %v1283_v26 = vld [vmem:[#allocation5 + $0xd0] sm:$0xf]  ;;  %v1566_v27 = vld [vmem:[#allocation5 + $0xd4] sm:$0xf0]  ;;  %v1220_v29 = vor.u32 %v1550_v24, %v1219_v23 }
  0x1f   :  { %v1420_v25 = vor.u32 %v1600_v22, %v1419_v20  ;;  %v1347_v28 = vld [vmem:[#allocation5 + $0x150] sm:$0xf]  ;;  %518 = vmatpush.bf16.msra.mxu0 %v1228_v16  ;;  %v1582_v30 = vld [vmem:[#allocation5 + $0x154] sm:$0xf0]  ;;  %v1284_v33 = vor.u32 %v1566_v27, %v1283_v26  ;;  %v1211_v35 = vld [vmem:[#allocation5 + $0x40] sm:$0xf] }
  0x20   :  { %v1411_v31 = vld [vmem:[#allocation5 + $0x1d0] sm:$0xf]  ;;  %v1598_v32 = vld [vmem:[#allocation5 + $0x1d4] sm:$0xf0]  ;;  %532 = vmatpush.bf16.msra.mxu1 %v1292_v17  ;;  %v1348_v34 = vor.u32 %v1582_v30, %v1347_v28  ;;  %v1548_v36 = vld [vmem:[#allocation5 + $0x44] sm:$0xf0] }
  0x21   :  { %546 = vmatpush.bf16.msra.mxu2 %v1356_v21  ;;  %v1275_v37 = vld [vmem:[#allocation5 + $0xc0] sm:$0xf]  ;;  %v1412_v38 = vor.u32 %v1598_v32, %v1411_v31  ;;  %v1564_v39 = vld [vmem:[#allocation5 + $0xc4] sm:$0xf0]  ;;  %v1212_v44 = vor.u32 %v1548_v36, %v1211_v35  ;;  %v1203_v47 = vld [vmem:[#allocation5 + $0x30] sm:$0xf] }
  0x22   :  { %560 = vmatpush.bf16.msra.mxu3 %v1420_v25  ;;  %v1339_v40 = vld [vmem:[#allocation5 + $0x140] sm:$0xf]  ;;  %v1580_v41 = vld [vmem:[#allocation5 + $0x144] sm:$0xf0]  ;;  %v1276_v45 = vor.u32 %v1564_v39, %v1275_v37  ;;  %v1546_v48 = vld [vmem:[#allocation5 + $0x34] sm:$0xf0] }
  0x23   :  { %v1403_v42 = vld [vmem:[#allocation5 + $0x1c0] sm:$0xf]  ;;  %v1596_v43 = vld [vmem:[#allocation5 + $0x1c4] sm:$0xf0]  ;;  %519 = vmatpush.bf16.msra.mxu0 %v1220_v29  ;;  %v1340_v46 = vor.u32 %v1580_v41, %v1339_v40  ;;  %v1267_v49 = vld [vmem:[#allocation5 + $0xb0] sm:$0xf]  ;;  %v1204_v56 = vor.u32 %v1546_v48, %v1203_v47 }
  0x24   :  { %533 = vmatpush.bf16.msra.mxu1 %v1284_v33  ;;  %v1404_v50 = vor.u32 %v1596_v43, %v1403_v42  ;;  %v1562_v51 = vld [vmem:[#allocation5 + $0xb4] sm:$0xf0]  ;;  %v1331_v52 = vld [vmem:[#allocation5 + $0x130] sm:$0xf]  ;;  %v1195_v59 = vld [vmem:[#allocation5 + $0x20] sm:$0xf] }
  0x25   :  { %547 = vmatpush.bf16.msra.mxu2 %v1348_v34  ;;  %v1578_v53 = vld [vmem:[#allocation5 + $0x134] sm:$0xf0]  ;;  %v1395_v54 = vld [vmem:[#allocation5 + $0x1b0] sm:$0xf]  ;;  %v1268_v57 = vor.u32 %v1562_v51, %v1267_v49  ;;  %v1544_v60 = vld [vmem:[#allocation5 + $0x24] sm:$0xf0] }
  0x26   :  { %561 = vmatpush.bf16.msra.mxu3 %v1412_v38  ;;  %v1594_v55 = vld [vmem:[#allocation5 + $0x1b4] sm:$0xf0]  ;;  %v1332_v58 = vor.u32 %v1578_v53, %v1331_v52  ;;  %v1259_v61 = vld [vmem:[#allocation5 + $0xa0] sm:$0xf]  ;;  %v1560_v63 = vld [vmem:[#allocation5 + $0xa4] sm:$0xf0]  ;;  %v1196_v4 = vor.u32 %v1544_v60, %v1195_v59 }
  0x27   :  { %520 = vmatpush.bf16.msra.mxu0 %v1212_v44  ;;  %v1396_v62 = vor.u32 %v1594_v55, %v1395_v54  ;;  %v1323_v0 = vld [vmem:[#allocation5 + $0x120] sm:$0xf]  ;;  %v1576_v1 = vld [vmem:[#allocation5 + $0x124] sm:$0xf0]  ;;  %v1187_v5 = vld [vmem:[#allocation5 + $0x10] sm:$0xf]  ;;  %v1260_v6 = vor.u32 %v1560_v63, %v1259_v61 }
  0x28   :  { %534 = vmatpush.bf16.msra.mxu1 %v1276_v45  ;;  %v1387_v2 = vld [vmem:[#allocation5 + $0x1a0] sm:$0xf]  ;;  %v1592_v3 = vld [vmem:[#allocation5 + $0x1a4] sm:$0xf0]  ;;  %v1324_v7 = vor.u32 %v1576_v1, %v1323_v0  ;;  %v1542_v8 = vld [vmem:[#allocation5 + $0x14] sm:$0xf0] }
  0x29   :  { %548 = vmatpush.bf16.msra.mxu2 %v1340_v46  ;;  %v1251_v9 = vld [vmem:[#allocation5 + $0x90] sm:$0xf]  ;;  %v1558_v10 = vld [vmem:[#allocation5 + $0x94] sm:$0xf0]  ;;  %v1388_v11 = vor.u32 %v1592_v3, %v1387_v2  ;;  %v1179_v16 = vld [vmem:[#allocation5] sm:$0xf]  ;;  %v1188_v18 = vor.u32 %v1542_v8, %v1187_v5 }
  0x2a   :  { %562 = vmatpush.bf16.msra.mxu3 %v1404_v50  ;;  %v1315_v12 = vld [vmem:[#allocation5 + $0x110] sm:$0xf]  ;;  %v1574_v13 = vld [vmem:[#allocation5 + $0x114] sm:$0xf0]  ;;  %v1540_v17 = vld [vmem:[#allocation5 + $0x4] sm:$0xf0]  ;;  %v1252_v23 = vor.u32 %v1558_v10, %v1251_v9 }
  0x2b   :  { %521 = vmatpush.bf16.msra.mxu0 %v1204_v56  ;;  %v1379_v14 = vld [vmem:[#allocation5 + $0x190] sm:$0xf]  ;;  %v1590_v15 = vld [vmem:[#allocation5 + $0x194] sm:$0xf0]  ;;  %v1243_v19 = vld [vmem:[#allocation5 + $0x80] sm:$0xf]  ;;  %v1316_v24 = vor.u32 %v1574_v13, %v1315_v12  ;;  %v1180_v35 = vor.u32 %v1540_v17, %v1179_v16 }
  0x2c   :  { %535 = vmatpush.bf16.msra.mxu1 %v1268_v57  ;;  %v1556_v20 = vld [vmem:[#allocation5 + $0x84] sm:$0xf0]  ;;  %v1307_v21 = vld [vmem:[#allocation5 + $0x100] sm:$0xf]  ;;  %v1553_v27 = vld [vmem:[#allocation5 + $0x74] sm:$0xf]  ;;  %v1380_v28 = vor.u32 %v1590_v15, %v1379_v14 }
  0x2d   :  { %549 = vmatpush.bf16.msra.mxu2 %v1332_v58  ;;  %v1572_v22 = vld [vmem:[#allocation5 + $0x104] sm:$0xf0]  ;;  %v1371_v25 = vld [vmem:[#allocation5 + $0x180] sm:$0xf]  ;;  %v1237_v29 = vld [vmem:[#allocation5 + $0x78] sm:$0xf0]  ;;  %v1244_v39 = vor.u32 %v1556_v20, %v1243_v19 }
  0x2e   :  { %563 = vmatpush.bf16.msra.mxu3 %v1396_v62  ;;  %v1588_v26 = vld [vmem:[#allocation5 + $0x184] sm:$0xf0]  ;;  %v1569_v30 = vld [vmem:[#allocation5 + $0xf4] sm:$0xf]  ;;  %v1301_v31 = vld [vmem:[#allocation5 + $0xf8] sm:$0xf0]  ;;  %v1308_v40 = vor.u32 %v1572_v22, %v1307_v21  ;;  %v1240_v45 = vor.u32 %v1553_v27, %v1237_v29 }
  0x2f   :  { %522 = vmatpush.bf16.msra.mxu0 %v1196_v4  ;;  %v1585_v32 = vld [vmem:[#allocation5 + $0x174] sm:$0xf]  ;;  %v1365_v33 = vld [vmem:[#allocation5 + $0x178] sm:$0xf0]  ;;  %v1171_v37 = vld [vmem:[#allocation2 + $0x8] sm:$0xf]  ;;  %v1372_v44 = vor.u32 %v1588_v26, %v1371_v25  ;;  %v1304_v49 = vor.u32 %v1569_v30, %v1301_v31 }
  0x30   :  { %536 = vmatpush.bf16.msra.mxu1 %v1260_v6  ;;  %v1601_v34 = vld [vmem:[#allocation5 + $0x1f4] sm:$0xf]  ;;  %v1429_v36 = vld [vmem:[#allocation5 + $0x1f8] sm:$0xf0]  ;;  %v1538_v38 = vld [vmem:[#allocation2 + $0x14] sm:$0xf0]  ;;  %v1368_v50 = vor.u32 %v1585_v32, %v1365_v33 }
  0x31   :  { %550 = vmatpush.bf16.msra.mxu2 %v1324_v7  ;;  %v1163_v41 = vld [vmem:[#allocation2] sm:$0xf]  ;;  %v1537_v42 = vld [vmem:[#allocation2 + $0xc] sm:$0xf0]  ;;  %v1536_v43 = vld [vmem:[#allocation2 + $0xc] sm:$0xf]  ;;  %v1432_v54 = vor.u32 %v1601_v34, %v1429_v36  ;;  %v1875_v55 = vor.u32 %v1538_v38, %v1171_v37 }
  0x32   :  { %564 = vmatpush.bf16.msra.mxu3 %v1388_v11  ;;  %v1173_v46 = vld [vmem:[#allocation2 + $0x18] sm:$0xf0]  ;;  %v1551_v47 = vld [vmem:[#allocation5 + $0x64] sm:$0xf]  ;;  %v1229_v48 = vld [vmem:[#allocation5 + $0x68] sm:$0xf0]  ;;  %v1877_v59 = vor.u32 %v1537_v42, %v1163_v41 }
  0x33   :  { %523 = vmatpush.bf16.msra.mxu0 %v1188_v18  ;;  %v1567_v51 = vld [vmem:[#allocation5 + $0xe4] sm:$0xf]  ;;  %v1165_v53 = vld [vmem:[#allocation2 + $0x10] sm:$0xf0]  ;;  %v1293_v56 = vld [vmem:[#allocation5 + $0xe8] sm:$0xf0]  ;;  %v1879_v60 = vor.u32 %v1536_v43, %v1173_v46  ;;  %v1232_v63 = vor.u32 %v1551_v47, %v1229_v48 }
  0x34   :  { %537 = vmatpush.bf16.msra.mxu1 %v1252_v23  ;;  %v1535_v52 = vld [vmem:[#allocation2 + $0x4] sm:$0xf]  ;;  %v1357_v58 = vld [vmem:[#allocation5 + $0x168] sm:$0xf0]  ;;  %v1296_v1 = vor.u32 %v1567_v51, %v1293_v56  ;;  %v1549_v3 = vld [vmem:[#allocation5 + $0x54] sm:$0xf] }
  0x35   :  { %551 = vmatpush.bf16.msra.mxu2 %v1316_v24  ;;  %v1583_v57 = vld [vmem:[#allocation5 + $0x164] sm:$0xf]  ;;  %v1421_v62 = vld [vmem:[#allocation5 + $0x1e8] sm:$0xf0]  ;;  %v1881_v0 = vor.u32 %v1535_v52, %v1165_v53  ;;  %v1221_v4 = vld [vmem:[#allocation5 + $0x58] sm:$0xf0] }
  0x36   :  { %565 = vmatpush.bf16.msra.mxu3 %v1380_v28  ;;  %v1599_v61 = vld [vmem:[#allocation5 + $0x1e4] sm:$0xf]  ;;  %v1360_v2 = vor.u32 %v1583_v57, %v1357_v58  ;;  %v1565_v5 = vld [vmem:[#allocation5 + $0xd4] sm:$0xf]  ;;  %v1285_v7 = vld [vmem:[#allocation5 + $0xd8] sm:$0xf0]  ;;  %v1224_v12 = vor.u32 %v1549_v3, %v1221_v4 }
  0x37   :  { %524 = vmatpush.bf16.msra.mxu0 %v1180_v35  ;;  %v1424_v6 = vor.u32 %v1599_v61, %v1421_v62  ;;  %v1581_v8 = vld [vmem:[#allocation5 + $0x154] sm:$0xf]  ;;  %v1349_v9 = vld [vmem:[#allocation5 + $0x158] sm:$0xf0]  ;;  %v1288_v13 = vor.u32 %v1565_v5, %v1285_v7  ;;  %v1547_v15 = vld [vmem:[#allocation5 + $0x44] sm:$0xf] }
  0x38   :  { %538 = vmatpush.bf16.msra.mxu1 %v1244_v39  ;;  %v1597_v10 = vld [vmem:[#allocation5 + $0x1d4] sm:$0xf]  ;;  %v1413_v11 = vld [vmem:[#allocation5 + $0x1d8] sm:$0xf0]  ;;  %v1352_v14 = vor.u32 %v1581_v8, %v1349_v9  ;;  %v1213_v16 = vld [vmem:[#allocation5 + $0x48] sm:$0xf0] }
  0x39   :  { %552 = vmatpush.bf16.msra.mxu2 %v1308_v40  ;;  %v1563_v17 = vld [vmem:[#allocation5 + $0xc4] sm:$0xf]  ;;  %v1416_v18 = vor.u32 %v1597_v10, %v1413_v11  ;;  %v1277_v19 = vld [vmem:[#allocation5 + $0xc8] sm:$0xf0]  ;;  %v1216_v24 = vor.u32 %v1547_v15, %v1213_v16  ;;  %v1545_v27 = vld [vmem:[#allocation5 + $0x34] sm:$0xf] }
  0x3a   :  { %566 = vmatpush.bf16.msra.mxu3 %v1372_v44  ;;  %525 = vmatmul.bf16.vlgmr.msra.gmra.mxu0 %v1877_v59  ;;  %v1579_v20 = vld [vmem:[#allocation5 + $0x144] sm:$0xf]  ;;  %v1341_v21 = vld [vmem:[#allocation5 + $0x148] sm:$0xf0]  ;;  %v1280_v25 = vor.u32 %v1563_v17, %v1277_v19  ;;  %v1205_v28 = vld [vmem:[#allocation5 + $0x38] sm:$0xf0] }
  0x3b   :  { %573 = vmatpush.bf16.msrb.mxu0 %v1240_v45  ;;  %539 = vmatmul.bf16.vlgmr.msra.gmra.mxu1 %v1881_v0  ;;  %v1595_v22 = vld [vmem:[#allocation5 + $0x1c4] sm:$0xf]  ;;  %v1405_v23 = vld [vmem:[#allocation5 + $0x1c8] sm:$0xf0]  ;;  %v1344_v26 = vor.u32 %v1579_v20, %v1341_v21  ;;  %v1561_v29 = vld [vmem:[#allocation5 + $0xb4] sm:$0xf]  ;;  %v1208_v36 = vor.u32 %v1545_v27, %v1205_v28 }
  0x3c   :  { %587 = vmatpush.bf16.msrb.mxu1 %v1304_v49  ;;  %553 = vmatmul.bf16.vlgmr.msra.gmra.mxu2 %v1875_v55  ;;  %v1408_v30 = vor.u32 %v1595_v22, %v1405_v23  ;;  %v1269_v31 = vld [vmem:[#allocation5 + $0xb8] sm:$0xf0]  ;;  %v1577_v32 = vld [vmem:[#allocation5 + $0x134] sm:$0xf]  ;;  %v1543_v37 = vld [vmem:[#allocation5 + $0x24] sm:$0xf] }
  0x3d   :  { %601 = vmatpush.bf16.msrb.mxu2 %v1368_v50  ;;  %567 = vmatmul.bf16.vlgmr.msra.gmra.mxu3 %v1879_v60  ;;  %v1333_v33 = vld [vmem:[#allocation5 + $0x138] sm:$0xf0]  ;;  %v1593_v34 = vld [vmem:[#allocation5 + $0x1b4] sm:$0xf]  ;;  %v1272_v38 = vor.u32 %v1561_v29, %v1269_v31  ;;  %v1197_v40 = vld [vmem:[#allocation5 + $0x28] sm:$0xf0] }
  0x3e   :  { %615 = vmatpush.bf16.msrb.mxu3 %v1432_v54  ;;  %v1397_v35 = vld [vmem:[#allocation5 + $0x1b8] sm:$0xf0]  ;;  %v1336_v39 = vor.u32 %v1577_v32, %v1333_v33  ;;  %v1559_v41 = vld [vmem:[#allocation5 + $0xa4] sm:$0xf]  ;;  %v1261_v43 = vld [vmem:[#allocation5 + $0xa8] sm:$0xf0]  ;;  %v1200_v48 = vor.u32 %v1543_v37, %v1197_v40 }
  0x3f   :  { %574 = vmatpush.bf16.msrb.mxu0 %v1232_v63  ;;  %v1400_v42 = vor.u32 %v1593_v34, %v1397_v35  ;;  %v1575_v44 = vld [vmem:[#allocation5 + $0x124] sm:$0xf]  ;;  %v1325_v45 = vld [vmem:[#allocation5 + $0x128] sm:$0xf0]  ;;  %v1264_v49 = vor.u32 %v1559_v41, %v1261_v43  ;;  %v1541_v51 = vld [vmem:[#allocation5 + $0x14] sm:$0xf] }
  0x40   :  { %588 = vmatpush.bf16.msrb.mxu1 %v1296_v1  ;;  %v1591_v46 = vld [vmem:[#allocation5 + $0x1a4] sm:$0xf]  ;;  %v1389_v47 = vld [vmem:[#allocation5 + $0x1a8] sm:$0xf0]  ;;  %v1328_v50 = vor.u32 %v1575_v44, %v1325_v45  ;;  %v1189_v52 = vld [vmem:[#allocation5 + $0x18] sm:$0xf0] }
  0x41   :  { %602 = vmatpush.bf16.msrb.mxu2 %v1360_v2  ;;  %v1557_v53 = vld [vmem:[#allocation5 + $0x94] sm:$0xf]  ;;  %v1392_v54 = vor.u32 %v1591_v46, %v1389_v47  ;;  %v1253_v56 = vld [vmem:[#allocation5 + $0x98] sm:$0xf0]  ;;  %v1192_v63 = vor.u32 %v1541_v51, %v1189_v52  ;;  %v1539_v3 = vld [vmem:[#allocation5 + $0x4] sm:$0xf] }
  0x42   :  { %616 = vmatpush.bf16.msrb.mxu3 %v1424_v6  ;;  %v1573_v57 = vld [vmem:[#allocation5 + $0x114] sm:$0xf]  ;;  %v1317_v58 = vld [vmem:[#allocation5 + $0x118] sm:$0xf0]  ;;  %v1256_v1 = vor.u32 %v1557_v53, %v1253_v56  ;;  %v1181_v4 = vld [vmem:[#allocation5 + $0x8] sm:$0xf0] }
  0x43   :  { %575 = vmatpush.bf16.msrb.mxu0 %v1224_v12  ;;  %v1589_v61 = vld [vmem:[#allocation5 + $0x194] sm:$0xf]  ;;  %v1381_v62 = vld [vmem:[#allocation5 + $0x198] sm:$0xf0]  ;;  %v1320_v2 = vor.u32 %v1573_v57, %v1317_v58  ;;  %v1555_v5 = vld [vmem:[#allocation5 + $0x84] sm:$0xf]  ;;  %v1184_v12 = vor.u32 %v1539_v3, %v1181_v4 }
  0x44   :  { %589 = vmatpush.bf16.msrb.mxu1 %v1288_v13  ;;  %v1384_v6 = vor.u32 %v1589_v61, %v1381_v62  ;;  %v1245_v7 = vld [vmem:[#allocation5 + $0x88] sm:$0xf0]  ;;  %v1571_v8 = vld [vmem:[#allocation5 + $0x104] sm:$0xf]  ;;  %v1891_v16 = vld [vmem:[#allocation7] sm:$0x3] }
  0x45   :  { %603 = vmatpush.bf16.msrb.mxu2 %v1352_v14  ;;  %v1309_v9 = vld [vmem:[#allocation5 + $0x108] sm:$0xf0]  ;;  %v1587_v10 = vld [vmem:[#allocation5 + $0x184] sm:$0xf]  ;;  %v1248_v13 = vor.u32 %v1555_v5, %v1245_v7  ;;  %v173_v17 = vperm.slane %v1891_v16, 0  ;;  %v1609_v33 = vld [vmem:[#allocation8 + $0x30] sm:$0xff] }
  0x46   :  { %617 = vmatpush.bf16.msrb.mxu3 %v1416_v18  ;;  %v1373_v11 = vld [vmem:[#allocation5 + $0x188] sm:$0xf0]  ;;  %v1312_v14 = vor.u32 %v1571_v8, %v1309_v9  ;;  %v1607_v45 = vld [vmem:[#allocation8 + $0x20] sm:$0xff]  ;;  %v1606_v53 = vld [vmem:[#allocation8 + $0x18] sm:$0xff]  ;;  %s1816_s30 = smov [#allocation11]   ;;  %s1146_s1 = sshll.u32 %s2023_s7, 4  ;;  %s1147_s1 = int_to_ptr.hbm [resolvable:$true] %s1146_s1 }
  0x47   :  { %576 = vmatpush.bf16.msrb.mxu0 %v1216_v24  ;;  %v1376_v15 = vor.u32 %v1587_v10, %v1373_v11  ;;  %v1605_v3 = vld [vmem:[#allocation8 + $0x10] sm:$0xff]  ;;  %s1144_s8 = sshll.u32 %s1816_s30, 4  ;;  %s1145_s8 = int_to_ptr.vmem [resolvable:$true] %s1144_s8 }
  0x48   :  { %590 = vmatpush.bf16.msrb.mxu1 %v1280_v25 }
  0x49   :  { %604 = vmatpush.bf16.msrb.mxu2 %v1344_v26 }
  0x4a   :  { %618 = vmatpush.bf16.msrb.mxu3 %v1408_v30 }
  0x4b   :  { %577 = vmatpush.bf16.msrb.mxu0 %v1208_v36 }
  0x4c   :  { %591 = vmatpush.bf16.msrb.mxu1 %v1272_v38 }
  0x4d   :  { %605 = vmatpush.bf16.msrb.mxu2 %v1336_v39  ;;  %v1608_v39 = vld [vmem:[#allocation8 + $0x28] sm:$0xff] }
  0x4e   :  { %619 = vmatpush.bf16.msrb.mxu3 %v1400_v42 }
  0x4f   :  { %578 = vmatpush.bf16.msrb.mxu0 %v1200_v48 }
  0x50   :  { %592 = vmatpush.bf16.msrb.mxu1 %v1264_v49 }
  0x51   :  { %606 = vmatpush.bf16.msrb.mxu2 %v1328_v50  ;;  %v174_v50 = vperm.slane %v1891_v16, 1 }
  0x52   :  { %620 = vmatpush.bf16.msrb.mxu3 %v1392_v54 }
  0x53   :  { %579 = vmatpush.bf16.msrb.mxu0 %v1192_v63 }
  0x54   :  { %593 = vmatpush.bf16.msrb.mxu1 %v1256_v1 }
  0x55   :  { %607 = vmatpush.bf16.msrb.mxu2 %v1320_v2 }
  0x56   :  { %621 = vmatpush.bf16.msrb.mxu3 %v1384_v6 }
  0x57   :  { %580 = vmatpush.bf16.msrb.mxu0 %v1184_v12 }
  0x58   :  { %594 = vmatpush.bf16.msrb.mxu1 %v1248_v13  ;;  %v1604_v13 = vld [vmem:[#allocation8 + $0x8] sm:$0xff] }
  0x59   :  { %608 = vmatpush.bf16.msrb.mxu2 %v1312_v14 }
  0x5a   :  { %622 = vmatpush.bf16.msrb.mxu3 %v1376_v15  ;;  %581 = vmatmul.bf16.vlgmr.msrb.gmra.mxu0 %v1877_v59 }
  0x5b   :  { %595 = vmatmul.bf16.vlgmr.msrb.gmra.mxu1 %v1881_v0 }
  0x5c   :  { %609 = vmatmul.bf16.vlgmr.msrb.gmra.mxu2 %v1875_v55 }
  0x5d   :  { %623 = vmatmul.bf16.vlgmr.msrb.gmra.mxu3 %v1879_v60  ;;  %v1610_v60 = vld [vmem:[#allocation8 + $0x38] sm:$0xff] }
  0x5e   :  { %939 = vmatpush.bf16.msra.mxu0 %v1610_v60 }
  0x62   :  { %940 = vmatpush.bf16.msra.mxu0 %v1609_v33 }
  0x66   :  { %941 = vmatpush.bf16.msra.mxu0 %v1608_v39 }
  0x6a   :  { %942 = vmatpush.bf16.msra.mxu0 %v1607_v45 }
  0x6e   :  { %943 = vmatpush.bf16.msra.mxu0 %v1606_v53 }
  0x72   :  { %944 = vmatpush.bf16.msra.mxu0 %v1605_v3  ;;  %v1615_v3 = vld [vmem:[#allocation8 + $0x60] sm:$0xff] }
  0x76   :  { %945 = vmatpush.bf16.msra.mxu0 %v1604_v13 }
  0xb7   :  { %v526_v18 = vpop.f32.mrf.mxu0 }
  0xb8   :  { %v527_v19 = vadd.f32 %v526_v18, %v173_v17  ;;  %v540_v20 = vpop.f32.mrf.mxu1 }
  0xba   :  { %v541_v21 = vadd.f32 %v540_v20, %v527_v19 }
  0xbf   :  { %v554_v22 = vpop.f32.mrf.mxu2  ;;  %v528_v59 = vpop.f32.mrf.mxu0 }
  0xc0   :  { %v555_v23 = vadd.f32 %v554_v22, %v541_v21  ;;  %v568_v24 = vpop.f32.mrf.mxu3  ;;  %v529_v26 = vadd.f32 %v528_v59, %v173_v17  ;;  %v542_v0 = vpop.f32.mrf.mxu1 }
  0xc2   :  { %v1894_v25 = vadd.f32 %v568_v24, %v555_v23  ;;  %v543_v27 = vadd.f32 %v542_v0, %v529_v26  ;;  %v1603_v23 = vld [vmem:[#allocation8] sm:$0xff]  ;;  %v1618_v26 = vld [vmem:[#allocation8 + $0x78] sm:$0xff] }
  0xc3   :  { %946 = vmatpush.bf16.msra.mxu0 %v1603_v23  ;;  %953 = vmatpush.bf16.msra.mxu1 %v1618_v26 }
  0xc4   :  { %v1897_v55 = vmul.f32 0.70710677, %v1894_v25 }
  0xc6   :  { %v637_v28 = vmul.f32 %v1897_v55, %v1897_v55 }
  0xc7   :  { %v556_v29 = vpop.f32.mrf.mxu2 }
  0xc8   :  { %v1901_v30 = vmin.f32 %v637_v28, 16.0  ;;  %v557_v31 = vadd.f32 %v556_v29, %v543_v27  ;;  %v570_v32 = vpop.f32.mrf.mxu3 }
  0xca   :  { %v639_v34 = vmul.f32 2.1237322e-06, %v1901_v30  ;;  %v650_v35 = vmul.f32 3.8918573e-05, %v1901_v30  ;;  %v1905_v36 = vadd.f32 %v570_v32, %v557_v31 }
  0xcc   :  { %v640_v37 = vadd.f32 0.00028619796, %v639_v34  ;;  %v651_v38 = vadd.f32 0.001143296, %v650_v35  ;;  %v1908_v40 = vmul.f32 0.70710677, %v1905_v36 }
  0xce   :  { %v652_v41 = vmul.f32 %v651_v38, %v1901_v30  ;;  %v717_v42 = vmul.f32 %v1908_v40, %v1908_v40  ;;  %v641_v43 = vmul.f32 %v640_v37, %v1901_v30  ;;  %v1617_v37 = vld [vmem:[#allocation8 + $0x70] sm:$0xff] }
  0xcf   :  { %954 = vmatpush.bf16.msra.mxu1 %v1617_v37 }
  0xd0   :  { %v653_v44 = vadd.f32 0.014752088, %v652_v41  ;;  %v1914_v46 = vmin.f32 %v717_v42, 16.0  ;;  %v642_v51 = vadd.f32 0.0036580483, %v641_v43 }
  0xd2   :  { %v654_v47 = vmul.f32 %v653_v44, %v1901_v30  ;;  %v719_v48 = vmul.f32 2.1237322e-06, %v1914_v46  ;;  %v730_v49 = vmul.f32 3.8918573e-05, %v1914_v46  ;;  %v643_v1 = vmul.f32 %v642_v51, %v1901_v30 }
  0xd4   :  { %v655_v52 = vadd.f32 0.112945676, %v654_v47  ;;  %v720_v54 = vadd.f32 0.00028619796, %v719_v48  ;;  %v731_v56 = vadd.f32 0.001143296, %v730_v49 }
  0xd5   :  { %v644_v10 = vadd.f32 0.05243302, %v643_v1 }
  0xd6   :  { %v656_v57 = vmul.f32 %v655_v52, %v1901_v30  ;;  %v721_v61 = vmul.f32 %v720_v54, %v1914_v46  ;;  %v732_v62 = vmul.f32 %v731_v56, %v1914_v46 }
  0xd7   :  { %v582_v58 = vpop.f32.mrf.mxu0  ;;  %v645_v20 = vmul.f32 %v644_v10, %v1901_v30 }
  0xd8   :  { %v583_v63 = vadd.f32 %v582_v58, %v174_v50  ;;  %v657_v2 = vadd.f32 0.4994258, %v656_v57  ;;  %v722_v4 = vadd.f32 0.0036580483, %v721_v61  ;;  %v733_v5 = vadd.f32 0.014752088, %v732_v62  ;;  %v596_v6 = vpop.f32.mrf.mxu1 }
  0xd9   :  { %v646_v29 = vadd.f32 0.18741608, %v645_v20 }
  0xda   :  { %v658_v7 = vmul.f32 %v657_v2, %v1901_v30  ;;  %v734_v8 = vmul.f32 %v733_v5, %v1914_v46  ;;  %v597_v9 = vadd.f32 %v596_v6, %v583_v63  ;;  %v723_v12 = vmul.f32 %v722_v4, %v1914_v46 }
  0xdb   :  { %v647_v43 = vmul.f32 %v646_v29, %v1901_v30 }
  0xdc   :  { %v659_v11 = vadd.f32 1.0, %v658_v7  ;;  %v735_v14 = vadd.f32 0.112945676, %v734_v8  ;;  %v724_v21 = vadd.f32 0.05243302, %v723_v12 }
  0xdd   :  { %v648_v30 = vadd.f32 1.1283791, %v647_v43 }
  0xde   :  { %1641 = vrcp.f32 %v659_v11  ;;  %v736_v18 = vmul.f32 %v735_v14, %v1914_v46  ;;  %v725_v31 = vmul.f32 %v724_v21, %v1914_v46  ;;  %v671_v49 = vand.u32 2147483648, %v659_v11 }
  0xdf   :  { %v610_v15 = vpop.f32.mrf.mxu2  ;;  %v584_v17 = vpop.f32.mrf.mxu0  ;;  %v669_v51 = vand.u32 2147483647, %v659_v11  ;;  %vm665_vm1 = vweird.f32 %v659_v11 }
  0xe0   :  { %v624_v16 = vpop.f32.mrf.mxu3  ;;  %v611_v19 = vadd.f32 %v610_v15, %v597_v9  ;;  %v585_v22 = vadd.f32 %v584_v17, %v174_v50  ;;  %v737_v24 = vadd.f32 0.4994258, %v736_v18  ;;  %v598_v27 = vpop.f32.mrf.mxu1  ;;  %v726_v44 = vadd.f32 0.18741608, %v725_v31  ;;  %v1616_v50 = vld [vmem:[#allocation8 + $0x68] sm:$0xff]  ;;  %v1614_v15 = vld [vmem:[#allocation8 + $0x58] sm:$0xff] }
  0xe1   :  { %955 = vmatpush.bf16.msra.mxu1 %v1616_v50  ;;  %v672_v1 = vor.u32 1.1754944e-38, %v671_v49  ;;  %vm670_vm3 = vcmp.eq.f32.partialorder %v669_v51, 8.507059e+37  ;;  %v631_v50 = vmul.f32 0.5, %v1905_v36 }
  0xe2   :  { %v1929_v59 = vadd.f32 %v624_v16, %v611_v19  ;;  %v738_v0 = vmul.f32 %v737_v24, %v1914_v46  ;;  %v599_v32 = vadd.f32 %v598_v27, %v585_v22  ;;  %v727_v57 = vmul.f32 %v726_v44, %v1914_v46  ;;  %v1613_v27 = vld [vmem:[#allocation8 + $0x50] sm:$0xff] }
  0xe3   :  { %v649_v46 = vmul.f32 %v648_v30, %v1897_v55  ;;  %v629_v44 = vmul.f32 0.5, %v1894_v25  ;;  %v1611_v30 = vld [vmem:[#allocation8 + $0x40] sm:$0xff] }
  0xe4   :  { %v1933_v60 = vmul.f32 0.70710677, %v1929_v59  ;;  %v1642_v28 = vpop.eup %1641  ;;  %v1936_v34 = vadd.f32 1.0, %v738_v0  ;;  %v728_v9 = vadd.f32 1.1283791, %v727_v57 }
  0xe5   :  { %v661_v33 = vmul.f32 %v1642_v28, %v659_v11  ;;  %vm666_vm0 = vweird.f32 %v1642_v28  ;;  %956 = vmatpush.bf16.msra.mxu1 %v1615_v3 }
  0xe6   :  { %v677_v38 = vmul.f32 %v1933_v60, %v1933_v60  ;;  %1643 = vrcp.f32 %v1936_v34  ;;  %vm667_vm2 = vmor %vm665_vm1, %vm666_vm0  ;;  %v749_v11 = vand.u32 2147483647, %v1936_v34  ;;  %v751_v12 = vand.u32 2147483648, %v1936_v34 }
  0xe7   :  { %v612_v35 = vpop.f32.mrf.mxu2  ;;  %v662_v41 = vsub.f32 1.0, %v661_v33  ;;  %vm745_vm5 = vweird.f32 %v1936_v34  ;;  %v729_v23 = vmul.f32 %v728_v9, %v1908_v40 }
  0xe8   :  { %v613_v39 = vadd.f32 %v612_v35, %v599_v32  ;;  %v626_v42 = vpop.f32.mrf.mxu3  ;;  %v1942_v45 = vmin.f32 %v677_v38, 16.0  ;;  %v752_v24 = vor.u32 1.1754944e-38, %v751_v12  ;;  %vm750_vm7 = vcmp.eq.f32.partialorder %v749_v11, 8.507059e+37 }
  0xe9   :  { %v663_v48 = vmul.f32 %v1642_v28, %v662_v41  ;;  %957 = vmatpush.bf16.msra.mxu1 %v1614_v15 }
  0xea   :  { %v1944_v47 = vadd.f32 %v626_v42, %v613_v39  ;;  %v679_v52 = vmul.f32 2.1237322e-06, %v1942_v45  ;;  %v690_v53 = vmul.f32 3.8918573e-05, %v1942_v45  ;;  %v1612_v39 = vld [vmem:[#allocation8 + $0x48] sm:$0xff] }
  0xeb   :  { %v664_v54 = vadd.f32 %v1642_v28, %v663_v48 }
  0xec   :  { %v1949_v56 = vmul.f32 0.70710677, %v1944_v47  ;;  %v680_v58 = vadd.f32 0.00028619796, %v679_v52  ;;  %v691_v61 = vadd.f32 0.001143296, %v690_v53  ;;  %v1644_v62 = vpop.eup %1643 }
  0xed   :  { %v668_v63 = vsel %vm667_vm2, %v1642_v28, %v664_v54  ;;  %v741_v4 = vmul.f32 %v1644_v62, %v1936_v34  ;;  %vm746_vm4 = vweird.f32 %v1644_v62  ;;  %958 = vmatpush.bf16.msra.mxu1 %v1613_v27 }
  0xee   :  { %v757_v2 = vmul.f32 %v1949_v56, %v1949_v56  ;;  %v673_v5 = vsel %vm670_vm3, %v672_v1, %v668_v63  ;;  %v681_v6 = vmul.f32 %v680_v58, %v1942_v45  ;;  %v692_v7 = vmul.f32 %v691_v61, %v1942_v45  ;;  %vm747_vm6 = vmor %vm745_vm5, %vm746_vm4 }
  0xef   :  { %v742_v10 = vsub.f32 1.0, %v741_v4  ;;  %v674_v16 = vmul.f32 %v673_v5, %v649_v46 }
  0xf0   :  { %v1957_v8 = vmin.f32 %v757_v2, 16.0  ;;  %v693_v13 = vadd.f32 0.014752088, %v692_v7  ;;  %v682_v19 = vadd.f32 0.0036580483, %v681_v6 }
  0xf1   :  { %v743_v17 = vmul.f32 %v1644_v62, %v742_v10  ;;  %v1433_v28 = vclamps-f32 %v674_v16, 1.0  ;;  %959 = vmatpush.bf16.msra.mxu1 %v1612_v39 }
  0xf2   :  { %v759_v14 = vmul.f32 2.1237322e-06, %v1957_v8  ;;  %v770_v18 = vmul.f32 3.8918573e-05, %v1957_v8  ;;  %v694_v20 = vmul.f32 %v693_v13, %v1942_v45  ;;  %v683_v33 = vmul.f32 %v682_v19, %v1942_v45 }
  0xf3   :  { %v744_v55 = vadd.f32 %v1644_v62, %v743_v17  ;;  %v797_v41 = vadd.f32 1.0, %v1433_v28 }
  0xf4   :  { %v760_v21 = vadd.f32 0.00028619796, %v759_v14  ;;  %v771_v22 = vadd.f32 0.001143296, %v770_v18  ;;  %v695_v26 = vadd.f32 0.112945676, %v694_v20 }
  0xf5   :  { %v748_v29 = vsel %vm747_vm6, %v1644_v62, %v744_v55  ;;  %v684_v48 = vadd.f32 0.05243302, %v683_v33  ;;  %v801_v57 = vmul.f32 %v797_v41, %v629_v44  ;;  %960 = vmatpush.bf16.msra.mxu1 %v1611_v30 }
  0xf6   :  { %v761_v0 = vmul.f32 %v760_v21, %v1957_v8  ;;  %v772_v31 = vmul.f32 %v771_v22, %v1957_v8  ;;  %v753_v32 = vsel %vm750_vm7, %v752_v24, %v748_v29  ;;  %v696_v35 = vmul.f32 %v695_v26, %v1942_v45 }
  0xf7   :  { %v754_v34 = vmul.f32 %v753_v32, %v729_v23  ;;  %v685_v62 = vmul.f32 %v684_v48, %v1942_v45  ;;  %v1626_v48 = vld [vmem:[#allocation10 + $0x38] sm:$0xff] }
  0xf8   :  { %v762_v37 = vadd.f32 0.0036580483, %v761_v0  ;;  %v773_v40 = vadd.f32 0.014752088, %v772_v31  ;;  %v697_v38 = vadd.f32 0.4994258, %v696_v35  ;;  %1124 = vmatpush.bf16.msra.mxu2 %v1626_v48 }
  0xf9   :  { %v1435_v42 = vclamps-f32 %v754_v34, 1.0  ;;  %v686_v36 = vadd.f32 0.18741608, %v685_v62  ;;  %v630_v35 = vmul.f32 0.5, %v1929_v59  ;;  %v632_v34 = vmul.f32 0.5, %v1944_v47 }
  0xfa   :  { %v774_v43 = vmul.f32 %v773_v40, %v1957_v8  ;;  %v698_v49 = vmul.f32 %v697_v38, %v1942_v45  ;;  %v763_v52 = vmul.f32 %v762_v37, %v1957_v8 }
  0xfb   :  { %v799_v51 = vadd.f32 1.0, %v1435_v42  ;;  %v687_v7 = vmul.f32 %v686_v36, %v1942_v45 }
  0xfc   :  { %v775_v53 = vadd.f32 0.112945676, %v774_v43  ;;  %v699_v54 = vadd.f32 1.0, %v698_v49  ;;  %v764_v63 = vadd.f32 0.05243302, %v763_v52 }
  0xfd   :  { %v803_v58 = vmul.f32 %v799_v51, %v631_v50  ;;  %v688_v13 = vadd.f32 1.1283791, %v687_v7  ;;  %v1625_v50 = vld [vmem:[#allocation10 + $0x30] sm:$0xff] }
  0xfe   :  { %v776_v61 = vmul.f32 %v775_v53, %v1957_v8  ;;  %1645 = vrcp.f32 %v699_v54  ;;  %v765_v3 = vmul.f32 %v764_v63, %v1957_v8  ;;  %v711_v10 = vand.u32 2147483648, %v699_v54  ;;  %1125 = vmatpush.bf16.msra.mxu2 %v1625_v50 }
  0xff   :  { %v805_v25 = vpack.c.bf16 %v803_v58, %v801_v57  ;;  %v709_v12 = vand.u32 2147483647, %v699_v54  ;;  %vm705_vm9 = vweird.f32 %v699_v54  ;;  %v689_v20 = vmul.f32 %v688_v13, %v1933_v60  ;;  %v1624_v58 = vld [vmem:[#allocation10 + $0x28] sm:$0xff] }
 0x100   :  { %v777_v1 = vadd.f32 0.4994258, %v776_v61  ;;  %v766_v9 = vadd.f32 0.18741608, %v765_v3  ;;  %v712_v17 = vor.u32 1.1754944e-38, %v711_v10 }
 0x101   :  { %947 = vmatmul.bf16.vlgmr.msra.gmra.mxu0 %v805_v25  ;;  %vm710_vm11 = vcmp.eq.f32.partialorder %v709_v12, 8.507059e+37 }
 0x102   :  { %v778_v2 = vmul.f32 %v777_v1, %v1957_v8  ;;  %v767_v16 = vmul.f32 %v766_v9, %v1957_v8  ;;  %1126 = vmatpush.bf16.msra.mxu2 %v1624_v58  ;;  %v1623_v1 = vld [vmem:[#allocation10 + $0x20] sm:$0xff] }
 0x104   :  { %v779_v4 = vadd.f32 1.0, %v778_v2  ;;  %v1646_v5 = vpop.eup %1645  ;;  %v768_v55 = vadd.f32 1.1283791, %v767_v16 }
 0x105   :  { %v701_v6 = vmul.f32 %v1646_v5, %v699_v54  ;;  %vm706_vm8 = vweird.f32 %v1646_v5 }
 0x106   :  { %1647 = vrcp.f32 %v779_v4  ;;  %vm707_vm10 = vmor %vm705_vm9, %vm706_vm8  ;;  %v791_v22 = vand.u32 2147483648, %v779_v4  ;;  %v789_v26 = vand.u32 2147483647, %v779_v4  ;;  %vm785_vm13 = vweird.f32 %v779_v4  ;;  %1127 = vmatpush.bf16.msra.mxu2 %v1623_v1 }
 0x107   :  { %v702_v46 = vsub.f32 1.0, %v701_v6  ;;  %v769_v28 = vmul.f32 %v768_v55, %v1949_v56  ;;  %v1639_v56 = vld [vmem:[%s2020_s4] ss:$0 sm:$0xff] }
 0x108   :  { %v792_v27 = vor.u32 1.1754944e-38, %v791_v22  ;;  %vm790_vm15 = vcmp.eq.f32.partialorder %v789_v26, 8.507059e+37  ;;  %v1622_v6 = vld [vmem:[#allocation10 + $0x18] sm:$0xff] }
 0x109   :  { %v703_v11 = vmul.f32 %v1646_v5, %v702_v46 }
 0x10a   :  { %1128 = vmatpush.bf16.msra.mxu2 %v1622_v6 }
 0x10b   :  { %v704_v15 = vadd.f32 %v1646_v5, %v703_v11 }
 0x10c   :  { %v1648_v14 = vpop.eup %1647 }
 0x10d   :  { %v781_v18 = vmul.f32 %v1648_v14, %v779_v4  ;;  %v708_v19 = vsel %vm707_vm10, %v1646_v5, %v704_v15  ;;  %vm786_vm12 = vweird.f32 %v1648_v14 }
 0x10e   :  { %v713_v45 = vsel %vm710_vm11, %v712_v17, %v708_v19  ;;  %vm787_vm14 = vmor %vm785_vm13, %vm786_vm12 }
 0x10f   :  { %v782_v21 = vsub.f32 1.0, %v781_v18  ;;  %v714_v23 = vmul.f32 %v713_v45, %v689_v20 }
 0x111   :  { %v783_v24 = vmul.f32 %v1648_v14, %v782_v21  ;;  %v1434_v8 = vclamps-f32 %v714_v23, 1.0  ;;  %v1620_v21 = vld [vmem:[#allocation10 + $0x8] sm:$0xff] }
 0x113   :  { %v784_v0 = vadd.f32 %v1648_v14, %v783_v24  ;;  %v798_v60 = vadd.f32 1.0, %v1434_v8 }
 0x115   :  { %v788_v29 = vsel %vm787_vm14, %v1648_v14, %v784_v0  ;;  %v802_v40 = vmul.f32 %v798_v60, %v630_v35  ;;  %v1621_v14 = vld [vmem:[#allocation10 + $0x10] sm:$0xff]  ;;  %v1619_v0 = vld [vmem:[#allocation10] sm:$0xff] }
 0x116   :  { %v793_v31 = vsel %vm790_vm15, %v792_v27, %v788_v29  ;;  %1129 = vmatpush.bf16.msra.mxu2 %v1621_v14  ;;  %v1640_v14 = vld [vmem:[%s2022_s6] ss:$0 sm:$0xff] }
 0x117   :  { %v794_v32 = vmul.f32 %v793_v31, %v769_v28 }
 0x119   :  { %v1436_v33 = vclamps-f32 %v794_v32, 1.0 }
 0x11a   :  { %1130 = vmatpush.bf16.msra.mxu2 %v1620_v21 }
 0x11b   :  { %v800_v37 = vadd.f32 1.0, %v1436_v33 }
 0x11d   :  { %v804_v38 = vmul.f32 %v800_v37, %v632_v34 }
 0x11e   :  { %1131 = vmatpush.bf16.msra.mxu2 %v1619_v0 }
 0x11f   :  { %v806_v39 = vpack.c.bf16 %v804_v38, %v802_v40 }
 0x121   :  { %961 = vmatmul.bf16.vlgmr.msra.gmra.mxu1 %v806_v39 }
 0x17e   :  { %v948_v41 = vpop.f32.mrf.mxu0 }
 0x17f   :  { %v949_v42 = vadd.f32 %v1639_v56, %v948_v41 }
 0x186   :  { %v950_v59 = vpop.f32.mrf.mxu0 }
 0x187   :  { %v951_v51 = vadd.f32 %v1639_v56, %v950_v59 }
 0x19e   :  { %v962_v43 = vpop.f32.mrf.mxu1 }
 0x19f   :  { %v1989_v44 = vadd.f32 %v962_v43, %v949_v42 }
 0x1a1   :  { %v1992_v49 = vmul.f32 0.70710677, %v1989_v44 }
 0x1a3   :  { %v971_v47 = vmul.f32 %v1992_v49, %v1992_v49 }
 0x1a5   :  { %v972_v52 = vmin.f32 %v971_v47, 16.0 }
 0x1a6   :  { %v964_v53 = vpop.f32.mrf.mxu1 }
 0x1a7   :  { %v973_v54 = vmul.f32 2.1237322e-06, %v972_v52  ;;  %v984_v30 = vmul.f32 3.8918573e-05, %v972_v52  ;;  %v1996_v57 = vadd.f32 %v964_v53, %v951_v51 }
 0x1a9   :  { %v974_v61 = vadd.f32 0.00028619796, %v973_v54  ;;  %v985_v62 = vadd.f32 0.001143296, %v984_v30  ;;  %v1999_v25 = vmul.f32 0.70710677, %v1996_v57 }
 0x1ab   :  { %v986_v63 = vmul.f32 %v985_v62, %v972_v52  ;;  %v1011_v2 = vmul.f32 %v1999_v25, %v1999_v25  ;;  %v975_v36 = vmul.f32 %v974_v61, %v972_v52 }
 0x1ad   :  { %v987_v3 = vadd.f32 0.014752088, %v986_v63  ;;  %v1012_v4 = vmin.f32 %v1011_v2, 16.0  ;;  %v976_v9 = vadd.f32 0.0036580483, %v975_v36 }
 0x1af   :  { %v988_v5 = vmul.f32 %v987_v3, %v972_v52  ;;  %v1013_v7 = vmul.f32 2.1237322e-06, %v1012_v4  ;;  %v1024_v46 = vmul.f32 3.8918573e-05, %v1012_v4  ;;  %v977_v17 = vmul.f32 %v976_v9, %v972_v52 }
 0x1b0   :  { %v968_v9 = vmul.f32 0.5, %v1996_v57 }
 0x1b1   :  { %v989_v10 = vadd.f32 0.112945676, %v988_v5  ;;  %v1014_v11 = vadd.f32 0.00028619796, %v1013_v7  ;;  %v1025_v12 = vadd.f32 0.001143296, %v1024_v46 }
 0x1b2   :  { %v978_v22 = vadd.f32 0.05243302, %v977_v17  ;;  %v967_v46 = vmul.f32 0.5, %v1989_v44 }
 0x1b3   :  { %v990_v13 = vmul.f32 %v989_v10, %v972_v52  ;;  %v1015_v15 = vmul.f32 %v1014_v11, %v1012_v4  ;;  %v1026_v16 = vmul.f32 %v1025_v12, %v1012_v4 }
 0x1b4   :  { %v979_v8 = vmul.f32 %v978_v22, %v972_v52 }
 0x1b5   :  { %v991_v18 = vadd.f32 0.4994258, %v990_v13  ;;  %v1016_v19 = vadd.f32 0.0036580483, %v1015_v15  ;;  %v1027_v20 = vadd.f32 0.014752088, %v1026_v16 }
 0x1b6   :  { %v980_v60 = vadd.f32 0.18741608, %v979_v8 }
 0x1b7   :  { %v992_v45 = vmul.f32 %v991_v18, %v972_v52  ;;  %v1028_v55 = vmul.f32 %v1027_v20, %v1012_v4  ;;  %v1017_v24 = vmul.f32 %v1016_v19, %v1012_v4 }
 0x1b8   :  { %v981_v40 = vmul.f32 %v980_v60, %v972_v52 }
 0x1b9   :  { %v993_v23 = vadd.f32 1.0, %v992_v45  ;;  %v1029_v26 = vadd.f32 0.112945676, %v1028_v55  ;;  %v1018_v28 = vadd.f32 0.05243302, %v1017_v24 }
 0x1ba   :  { %v982_v43 = vadd.f32 1.1283791, %v981_v40 }
 0x1bb   :  { %1649 = vrcp.f32 %v993_v23  ;;  %v1030_v27 = vmul.f32 %v1029_v26, %v1012_v4  ;;  %v1019_v35 = vmul.f32 %v1018_v28, %v1012_v4  ;;  %v1005_v39 = vand.u32 2147483648, %v993_v23 }
 0x1bc   :  { %v1003_v56 = vand.u32 2147483647, %v993_v23  ;;  %vm999_vm1 = vweird.f32 %v993_v23  ;;  %v983_v54 = vmul.f32 %v982_v43, %v1992_v49 }
 0x1bd   :  { %v1031_v29 = vadd.f32 0.4994258, %v1030_v27  ;;  %v1020_v41 = vadd.f32 0.18741608, %v1019_v35  ;;  %v1006_v47 = vor.u32 1.1754944e-38, %v1005_v39 }
 0x1be   :  { %vm1004_vm3 = vcmp.eq.f32.partialorder %v1003_v56, 8.507059e+37 }
 0x1bf   :  { %v1032_v31 = vmul.f32 %v1031_v29, %v1012_v4  ;;  %v1021_v50 = vmul.f32 %v1020_v41, %v1012_v4 }
 0x1c1   :  { %v1650_v32 = vpop.eup %1649  ;;  %v1033_v34 = vadd.f32 1.0, %v1032_v31  ;;  %v1022_v52 = vadd.f32 1.1283791, %v1021_v50 }
 0x1c2   :  { %v995_v33 = vmul.f32 %v1650_v32, %v993_v23  ;;  %vm1000_vm0 = vweird.f32 %v1650_v32 }
 0x1c3   :  { %1651 = vrcp.f32 %v1033_v34  ;;  %vm1001_vm2 = vmor %vm999_vm1, %vm1000_vm0  ;;  %v1045_v58 = vand.u32 2147483648, %v1033_v34  ;;  %v1043_v63 = vand.u32 2147483647, %v1033_v34  ;;  %vm1039_vm5 = vweird.f32 %v1033_v34 }
 0x1c4   :  { %v996_v37 = vsub.f32 1.0, %v995_v33  ;;  %v1023_v3 = vmul.f32 %v1022_v52, %v1999_v25 }
 0x1c5   :  { %v1046_v2 = vor.u32 1.1754944e-38, %v1045_v58  ;;  %vm1044_vm7 = vcmp.eq.f32.partialorder %v1043_v63, 8.507059e+37 }
 0x1c6   :  { %v997_v38 = vmul.f32 %v1650_v32, %v996_v37 }
 0x1c8   :  { %v998_v42 = vadd.f32 %v1650_v32, %v997_v38 }
 0x1c9   :  { %v1652_v48 = vpop.eup %1651 }
 0x1ca   :  { %v1002_v59 = vsel %vm1001_vm2, %v1650_v32, %v998_v42  ;;  %v1035_v51 = vmul.f32 %v1652_v48, %v1033_v34  ;;  %vm1040_vm4 = vweird.f32 %v1652_v48 }
 0x1cb   :  { %v1007_v53 = vsel %vm1004_vm3, %v1006_v47, %v1002_v59  ;;  %vm1041_vm6 = vmor %vm1039_vm5, %vm1040_vm4 }
 0x1cc   :  { %v1036_v30 = vsub.f32 1.0, %v1035_v51  ;;  %v1008_v61 = vmul.f32 %v1007_v53, %v983_v54 }
 0x1ce   :  { %v1037_v62 = vmul.f32 %v1652_v48, %v1036_v30  ;;  %v1501_v36 = vclamps-f32 %v1008_v61, 1.0 }
 0x1d0   :  { %v1038_v1 = vadd.f32 %v1652_v48, %v1037_v62  ;;  %v1051_v7 = vadd.f32 1.0, %v1501_v36 }
 0x1d2   :  { %v1042_v4 = vsel %vm1041_vm6, %v1652_v48, %v1038_v1  ;;  %v1053_v11 = vmul.f32 %v1051_v7, %v967_v46 }
 0x1d3   :  { %v1047_v5 = vsel %vm1044_vm7, %v1046_v2, %v1042_v4 }
 0x1d4   :  { %v1048_v6 = vmul.f32 %v1047_v5, %v1023_v3 }
 0x1d6   :  { %v1502_v49 = vclamps-f32 %v1048_v6, 1.0 }
 0x1d8   :  { %v1052_v10 = vadd.f32 1.0, %v1502_v49 }
 0x1da   :  { %v1054_v12 = vmul.f32 %v1052_v10, %v968_v9 }
 0x1dc   :  { %v1055_v13 = vpack.c.bf16 %v1054_v12, %v1053_v11 }
 0x1de   :  { %1132 = vmatmul.bf16.vlgmr.msra.gmra.mxu2 %v1055_v13 }
 0x261   :  { %v1133_v25 = vpop.f32.mrf.mxu2 }
 0x262   :  { %v1134_v15 = vadd.f32 %v1640_v14, %v1133_v25 }
 0x264   :  { %1138 = vst [vmem:[#allocation11] sm:$0xff] %v1134_v15 }
 0x269   :  { %v1135_v44 = vpop.f32.mrf.mxu2 }
 0x26a   :  { %v1136_v57 = vadd.f32 %v1640_v14, %v1135_v44 }
 0x26c   :  { %1139 = vst [vmem:[#allocation11 + $0x8] sm:$0xff] %v1136_v57 }
 0x26d   :  { %1152 = dma.vmem_to_hbm [thread:$0]  %s1145_s8, 256, %s1147_s1, [#allocation4], %s1806_s9, %s1806_s9, %s1807_s10  }
 0x26e   :  { %1803 = dma.done.wait [#allocation4], 256  }
 0x26f   :  { %1804 = vsyncadd [#allocation4], 4294967040 }
 0x270   :  { %1157 = vsyncpa [#allocation3], 1 }
 0x271   :  { %1158 = vsyncpa [#allocation6], 1 }
 0x272   :  { %1159 = vsyncpa [#allocation9], 1 }
 0x273   :  { %1160 = vsyncpa [#allocation4], 1 }

</bundles_post_ra>
